<compile_context>
chip_gen: v7x
topology: tpu7x:2x2x1
jax: 0.10.0
libtpu: 0.0.40
codegen_flags: <defaults>
</compile_context>

<pallas_src>
import functools

import jax
import jax.numpy as jnp
from jax import lax
from jax.experimental import pallas as pl
from jax.experimental.pallas import tpu as pltpu


def extract_kernel(x_ref, w3_ref, b3_ref, w1_ref, b1_ref, out_ref):
    x = x_ref[...].astype(jnp.bfloat16)                        # (tb, HWC) bf16
    x3 = jnp.dot(x, w3_ref[...], preferred_element_type=jnp.float32)
    x3 = jnp.maximum(x3 + b3_ref[...], 0.0)                    # relu(conv3), broadcast cols
    x1 = jnp.dot(x, w1_ref[...], preferred_element_type=jnp.float32)
    x1 = jnp.maximum(x1 + b1_ref[...], 0.0)                    # relu(conv1), all pixels
    out_ref[...] = (x3 + x1).astype(out_ref.dtype)             # fused broadcast add


@functools.partial(jax.jit, static_argnames=("block_rows",))
def extract_forward(x_nchw, w3, b3, w1, b1, *, block_rows=2048):
    N, C, H, W = x_nchw.shape
    Ho = (H + 2 - 3) // 2 + 1
    Wo = (W + 2 - 3) // 2 + 1
    if H not in (1, 2) or W not in (1, 2) or (Ho, Wo) != (1, 1):
        raise ValueError("x3 + x1 only broadcasts for H, W in {1, 2} "
                         "(same restriction as the PyTorch module)")
    HW = H * W
    HWC = C * HW

    # Channel-major flatten: zero-cost reshape of the NCHW layout (no transpose).
    # Flat index = c*HW + i*W + j for both input rows and output columns.
    x2d = x_nchw.reshape(N, HWC)

    # conv3 (k=3, s=2, p=1) has a single output pixel; keep only the taps that
    # land inside the image (ki in [1,H], kj in [1,W]) -> padding folded into
    # the weight. Rows ordered (c, i, j); repeating each output column HW
    # times realizes the PyTorch spatial broadcast in channel-major order.
    w3_cm = jnp.transpose(w3[:, :, 1:1 + H, 1:1 + W], (1, 2, 3, 0)).reshape(HWC, C)
    w3_big = jnp.repeat(w3_cm, HW, axis=1)                     # (HWC, HWC)
    b3_big = jnp.repeat(b3, HW).reshape(1, HWC).astype(jnp.float32)

    # conv1 on every pixel as one matmul: block weight kron(W1^T, I_HW) in
    # channel-major layout (input row c*HW+p contributes to output col o*HW+p).
    w1m = jnp.transpose(w1[:, :, 0, 0], (1, 0))                # (Cin, Cout)
    w1_big = jnp.kron(w1m, jnp.eye(HW, dtype=w1m.dtype))       # (HWC, HWC)
    b1_big = jnp.repeat(b1, HW).reshape(1, HWC).astype(jnp.float32)

    # Batch-row tiling (sublane axis). Full-extent block if N fits one tile.
    if N <= block_rows:
        tb = N
        n_pad = N
        x_in = x2d
    else:
        tb = max(8, (min(block_rows, N) // 8) * 8)
        n_pad = pl.cdiv(N, tb) * tb
        x_in = jnp.pad(x2d, ((0, n_pad - N), (0, 0))) if n_pad != N else x2d

    out2d = pl.pallas_call(
        extract_kernel,
        out_shape=jax.ShapeDtypeStruct((n_pad, HWC), x_nchw.dtype),
        grid_spec=pltpu.PrefetchScalarGridSpec(
            num_scalar_prefetch=0,
            grid=(n_pad // tb,),
            in_specs=[
                pl.BlockSpec((tb, HWC), lambda i: (i, 0)),     # x rows (pipelined)
                pl.BlockSpec((HWC, HWC), lambda i: (0, 0)),    # conv3 weights (resident)
                pl.BlockSpec((1, HWC), lambda i: (0, 0)),      # conv3 bias (resident)
                pl.BlockSpec((HWC, HWC), lambda i: (0, 0)),    # conv1 weights (resident)
                pl.BlockSpec((1, HWC), lambda i: (0, 0)),      # conv1 bias (resident)
            ],
            out_specs=pl.BlockSpec((tb, HWC), lambda i: (i, 0)),
        ),
        compiler_params=pltpu.CompilerParams(
            dimension_semantics=("parallel",)),
    )(x_in, w3_big.astype(jnp.bfloat16), b3_big,
      w1_big.astype(jnp.bfloat16), b1_big)

    # Channel-major output -> NCHW is a free reshape (no transpose).
    return out2d[:N].reshape(N, C, H, W)


def _reference(x, w3, b3, w1, b1):
    # Pure-JAX reference reproducing the PyTorch forward on the same
    # bf16-rounded operands the kernel feeds the MXU (f32 accumulation).
    xr = x.astype(jnp.bfloat16).astype(jnp.float32)
    w3r = w3.astype(jnp.bfloat16).astype(jnp.float32)
    w1r = w1.astype(jnp.bfloat16).astype(jnp.float32)
    x3 = lax.conv_general_dilated(xr, w3r, (2, 2), ((1, 1), (1, 1)),
                                  dimension_numbers=("NCHW", "OIHW", "NCHW"),
                                  precision=lax.Precision.HIGHEST)
    x3 = jnp.maximum(x3 + b3[None, :, None, None], 0.0)
    x1 = lax.conv_general_dilated(xr, w1r, (1, 1), "VALID",
                                  dimension_numbers=("NCHW", "OIHW", "NCHW"),
                                  precision=lax.Precision.HIGHEST)
    x1 = jnp.maximum(x1 + b1[None, :, None, None], 0.0)
    return x3 + x1                                             # broadcast add


if __name__ == "__main__":
    key = jax.random.PRNGKey(0)
    kx, k3w, k3b, k1w, k1b = jax.random.split(key, 5)
    N, C, H, W = 16, 32, 2, 2          # H=W=2 is what the broadcast-add implies
    x = jax.random.normal(kx, (N, C, H, W), jnp.float32)
    w3 = jax.random.normal(k3w, (C, C, 3, 3), jnp.float32) * 0.1
    b3 = jax.random.normal(k3b, (C,), jnp.float32) * 0.1
    w1 = jax.random.normal(k1w, (C, C, 1, 1), jnp.float32) * 0.1
    b1 = jax.random.normal(k1b, (C,), jnp.float32) * 0.1

    ref = _reference(x, w3, b3, w1, b1)

    # Single-block path (grid of 1) and multi-step pipelined path (2 steps).
    for br in (2048, 8):
        out = jax.block_until_ready(extract_forward(x, w3, b3, w1, b1, block_rows=br))
        assert out.shape == ref.shape, (out.shape, ref.shape)
        assert jnp.allclose(out, ref, atol=1e-3, rtol=1e-3), float(
            jnp.max(jnp.abs(out - ref)))
    print("KERNEL_OK")
</pallas_src>

<mosaic_0001>
module attributes {stable_mosaic.version = 11 : i64} {
  func.func @extract_kernel(%arg0: i32, %arg1: memref<16x128xf32, #tpu.memory_space<vmem>>, %arg2: memref<128x128xbf16, #tpu.memory_space<vmem>>, %arg3: memref<1x128xf32, #tpu.memory_space<vmem>>, %arg4: memref<128x128xbf16, #tpu.memory_space<vmem>>, %arg5: memref<1x128xf32, #tpu.memory_space<vmem>>, %arg6: memref<16x128xf32, #tpu.memory_space<vmem>>) attributes {dimension_semantics = [#tpu.dimension_semantics<parallel>], iteration_bounds = array<i64: 1>, scalar_prefetch = 0 : i64, scratch_operands = 0 : i64, tpu.core_type = #tpu.core_type<tc>, window_params = [{transform_indices = @transform_0, window_bounds = array<i64: 16, 128>}, {pipeline_mode = #tpu.pipeline_mode<synchronous>, transform_indices = @transform_1, window_bounds = array<i64: 128, 128>}, {pipeline_mode = #tpu.pipeline_mode<synchronous>, transform_indices = @transform_2, window_bounds = array<i64: 1, 128>}, {pipeline_mode = #tpu.pipeline_mode<synchronous>, transform_indices = @transform_3, window_bounds = array<i64: 128, 128>}, {pipeline_mode = #tpu.pipeline_mode<synchronous>, transform_indices = @transform_4, window_bounds = array<i64: 1, 128>}, {transform_indices = @transform_5, window_bounds = array<i64: 16, 128>}]} {
    %c0 = arith.constant 0 : index
    %c0_0 = arith.constant 0 : index
    %0 = vector.load %arg1[%c0, %c0_0] : memref<16x128xf32, #tpu.memory_space<vmem>>, vector<16x128xf32>
    %1 = arith.truncf %0 : vector<16x128xf32> to vector<16x128xbf16>
    %c0_1 = arith.constant 0 : index
    %c0_2 = arith.constant 0 : index
    %2 = vector.load %arg2[%c0_1, %c0_2] : memref<128x128xbf16, #tpu.memory_space<vmem>>, vector<128x128xbf16>
    %cst = arith.constant dense<0.000000e+00> : vector<16x128xf32>
    %3 = tpu.matmul %1, %2, %cst {dimension_numbers = #tpu.dot_dimension_numbers<[1], [0], [0], [1], [0, 0, 1, 1], [], []>} : vector<16x128xbf16>, vector<128x128xbf16>, vector<16x128xf32> -> vector<16x128xf32>
    %c0_3 = arith.constant 0 : index
    %c0_4 = arith.constant 0 : index
    %4 = vector.load %arg3[%c0_3, %c0_4] : memref<1x128xf32, #tpu.memory_space<vmem>>, vector<1x128xf32>
    %5 = vector.broadcast %4 : vector<1x128xf32> to vector<16x128xf32>
    %6 = arith.addf %3, %5 : vector<16x128xf32>
    %cst_5 = arith.constant 0.000000e+00 : f32
    %7 = vector.broadcast %cst_5 : f32 to vector<16x128xf32>
    %8 = arith.maximumf %6, %7 : vector<16x128xf32>
    %c0_6 = arith.constant 0 : index
    %c0_7 = arith.constant 0 : index
    %9 = vector.load %arg4[%c0_6, %c0_7] : memref<128x128xbf16, #tpu.memory_space<vmem>>, vector<128x128xbf16>
    %cst_8 = arith.constant dense<0.000000e+00> : vector<16x128xf32>
    %10 = tpu.matmul %1, %9, %cst_8 {dimension_numbers = #tpu.dot_dimension_numbers<[1], [0], [0], [1], [0, 0, 1, 1], [], []>} : vector<16x128xbf16>, vector<128x128xbf16>, vector<16x128xf32> -> vector<16x128xf32>
    %c0_9 = arith.constant 0 : index
    %c0_10 = arith.constant 0 : index
    %11 = vector.load %arg5[%c0_9, %c0_10] : memref<1x128xf32, #tpu.memory_space<vmem>>, vector<1x128xf32>
    %12 = vector.broadcast %11 : vector<1x128xf32> to vector<16x128xf32>
    %13 = arith.addf %10, %12 : vector<16x128xf32>
    %cst_11 = arith.constant 0.000000e+00 : f32
    %14 = vector.broadcast %cst_11 : f32 to vector<16x128xf32>
    %15 = arith.maximumf %13, %14 : vector<16x128xf32>
    %16 = arith.addf %8, %15 : vector<16x128xf32>
    %c0_12 = arith.constant 0 : index
    %c0_13 = arith.constant 0 : index
    %17 = vector.load %arg6[%c0_12, %c0_13] : memref<16x128xf32, #tpu.memory_space<vmem>>, vector<16x128xf32>
    tpu.vector_store %arg6[%c0_12, %c0_13], %16 {strides = array<i32>} : memref<16x128xf32, #tpu.memory_space<vmem>>, vector<16x128xf32>,
    return
  }
  func.func @transform_0(%arg0: i32) -> (i32, i32) {
    %c0_i32 = arith.constant 0 : i32
    %c0_i32_0 = arith.constant 0 : i32
    return %arg0, %c0_i32 : i32, i32
  }
  func.func @transform_1(%arg0: i32) -> (i32, i32) {
    %c0_i32 = arith.constant 0 : i32
    %c0_i32_0 = arith.constant 0 : i32
    %c0_i32_1 = arith.constant 0 : i32
    return %c0_i32, %c0_i32_0 : i32, i32
  }
  func.func @transform_2(%arg0: i32) -> (i32, i32) {
    %c0_i32 = arith.constant 0 : i32
    %c0_i32_0 = arith.constant 0 : i32
    %c0_i32_1 = arith.constant 0 : i32
    return %c0_i32, %c0_i32_0 : i32, i32
  }
  func.func @transform_3(%arg0: i32) -> (i32, i32) {
    %c0_i32 = arith.constant 0 : i32
    %c0_i32_0 = arith.constant 0 : i32
    %c0_i32_1 = arith.constant 0 : i32
    return %c0_i32, %c0_i32_0 : i32, i32
  }
  func.func @transform_4(%arg0: i32) -> (i32, i32) {
    %c0_i32 = arith.constant 0 : i32
    %c0_i32_0 = arith.constant 0 : i32
    %c0_i32_1 = arith.constant 0 : i32
    return %c0_i32, %c0_i32_0 : i32, i32
  }
  func.func @transform_5(%arg0: i32) -> (i32, i32) {
    %c0_i32 = arith.constant 0 : i32
    %c0_i32_0 = arith.constant 0 : i32
    return %arg0, %c0_i32 : i32, i32
  }
}

</mosaic_0001>

<bundles_post_ra>
// kernel: extract_forward.1
= control target key start
LH: loop header
LB: loop body
LE: loop exit
PB: predicated region body
PF: predicated region fallthrough
CT: control target
= control target key end

     0   :  { %v354_v0 = vmov 0.0   ;;  %vm355_vm0 = vmmov 0   ;;  %s452_s1 = inlined_call_operand.vmem [shape: bf16[128,128], index: 1, kind: input, shape index: {}]   ;;  %s453_s3 = inlined_call_operand.vmem [shape: bf16[128,128], index: 3, kind: input, shape index: {}]   ;;  %s454_s0 = inlined_call_operand.vmem [shape: f32[16,128], index: 0, kind: input, shape index: {}]   ;;  %s455_s2 = inlined_call_operand.vmem [shape: f32[1,128], index: 2, kind: input, shape index: {}]   ;;  %s456_s4 = inlined_call_operand.vmem [shape: f32[1,128], index: 4, kind: input, shape index: {}]   ;;  %s457_s5 = inlined_call_operand.vmem [shape: f32[16,128], index: 5, kind: output, shape index: {}]  }
   0x1   :  { %296 = vmatprep.subr.bf16.mxu0 %v354_v0  ;;  %316 = vmatprep.subr.bf16.mxu1 %v354_v0  ;;  %v338_v1 = vld [vmem:[%s452_s1] sm:$0xff]   ;;  %v340_v3 = vld [vmem:[%s452_s1 + $0x8] sm:$0xff]   ;;  %v342_v5 = vld [vmem:[%s452_s1 + $0x10] sm:$0xff]  }
   0x2   :  { %v339_v2 = vld [vmem:[%s453_s3] sm:$0xff]   ;;  %312 = vmatprep.mubr.msk.bf16.mxu0 %vm355_vm0, %v354_v0  ;;  %332 = vmatprep.mubr.msk.bf16.mxu1 %vm355_vm0, %v354_v0  ;;  %v341_v4 = vld [vmem:[%s453_s3 + $0x8] sm:$0xff]   ;;  %v343_v6 = vld [vmem:[%s453_s3 + $0x10] sm:$0xff]  }
   0x3   :  { %297 = vmatpush3.bf16.msra.mxu0 %v338_v1  ;;  %317 = vmatpush3.bf16.msra.mxu1 %v339_v2  ;;  %v344_v7 = vld [vmem:[%s452_s1 + $0x18] sm:$0xff]   ;;  %v346_v9 = vld [vmem:[%s452_s1 + $0x20] sm:$0xff]   ;;  %v348_v11 = vld [vmem:[%s452_s1 + $0x28] sm:$0xff]  }
   0x4   :  { %298 = vmatprep.subr.bf16.mxu0 %v354_v0  ;;  %318 = vmatprep.subr.bf16.mxu1 %v354_v0  ;;  %v345_v8 = vld [vmem:[%s453_s3 + $0x18] sm:$0xff]   ;;  %v347_v10 = vld [vmem:[%s453_s3 + $0x20] sm:$0xff]   ;;  %v349_v12 = vld [vmem:[%s453_s3 + $0x28] sm:$0xff]  }
   0x5   :  { %v350_v13 = vld [vmem:[%s452_s1 + $0x30] sm:$0xff]   ;;  %v352_v15 = vld [vmem:[%s452_s1 + $0x38] sm:$0xff]   ;;  %v21_v16 = vld [vmem:[%s454_s0] sm:$0xff] }
   0x6   :  { %v351_v14 = vld [vmem:[%s453_s3 + $0x30] sm:$0xff]   ;;  %v22_v17 = vld [vmem:[%s454_s0 + $0x8] sm:$0xff]  ;;  %v353_v18 = vld [vmem:[%s453_s3 + $0x38] sm:$0xff]  }
   0x7   :  { %299 = vmatpush3.bf16.msra.mxu0 %v340_v3  ;;  %319 = vmatpush3.bf16.msra.mxu1 %v341_v4  ;;  %v23_v19 = vpack.c.bf16 %v22_v17, %v21_v16  ;;  %v260_v20 = vld [vmem:[%s455_s2] ss:$0 sm:$0xff] }
   0x8   :  { %300 = vmatprep.subr.bf16.mxu0 %v354_v0  ;;  %320 = vmatprep.subr.bf16.mxu1 %v354_v0  ;;  %v269_v21 = vld [vmem:[%s456_s4] ss:$0 sm:$0xff] }
   0xb   :  { %301 = vmatpush3.bf16.msra.mxu0 %v342_v5  ;;  %321 = vmatpush3.bf16.msra.mxu1 %v343_v6 }
   0xc   :  { %302 = vmatprep.subr.bf16.mxu0 %v354_v0  ;;  %322 = vmatprep.subr.bf16.mxu1 %v354_v0 }
   0xf   :  { %303 = vmatpush3.bf16.msra.mxu0 %v344_v7  ;;  %323 = vmatpush3.bf16.msra.mxu1 %v345_v8 }
  0x10   :  { %304 = vmatprep.subr.bf16.mxu0 %v354_v0  ;;  %324 = vmatprep.subr.bf16.mxu1 %v354_v0 }
  0x13   :  { %305 = vmatpush3.bf16.msra.mxu0 %v346_v9  ;;  %325 = vmatpush3.bf16.msra.mxu1 %v347_v10 }
  0x14   :  { %306 = vmatprep.subr.bf16.mxu0 %v354_v0  ;;  %326 = vmatprep.subr.bf16.mxu1 %v354_v0 }
  0x17   :  { %307 = vmatpush3.bf16.msra.mxu0 %v348_v11  ;;  %327 = vmatpush3.bf16.msra.mxu1 %v349_v12 }
  0x18   :  { %308 = vmatprep.subr.bf16.mxu0 %v354_v0  ;;  %328 = vmatprep.subr.bf16.mxu1 %v354_v0 }
  0x1b   :  { %309 = vmatpush3.bf16.msra.mxu0 %v350_v13  ;;  %329 = vmatpush3.bf16.msra.mxu1 %v351_v14 }
  0x1c   :  { %310 = vmatprep.subr.bf16.mxu0 %v354_v0  ;;  %330 = vmatprep.subr.bf16.mxu1 %v354_v0 }
  0x1f   :  { %311 = vmatpush3.bf16.msra.mxu0 %v352_v15  ;;  %331 = vmatpush3.bf16.msra.mxu1 %v353_v18 }
  0x22   :  { %313 = vmatmul.mubr.bf16.vlgmr.msra.gmra.mrb[0].mxu0 %v23_v19  ;;  %333 = vmatmul.mubr.bf16.vlgmr.msra.gmra.mrb[0].mxu1 %v23_v19 }
  0xf5   :  { %v129_v22 = vpop.f32.mrb[0].mxu0  ;;  %v243_v24 = vpop.f32.mrb[0].mxu1 }
  0xf6   :  { %v130_v23 = vadd.f32 %v260_v20, %v129_v22  ;;  %v314_v25 = vpop.f32.mrb[1].mxu0  ;;  %v244_v26 = vadd.f32 %v269_v21, %v243_v24  ;;  %v334_v27 = vpop.f32.mrb[1].mxu1 }
  0xf7   :  { %v132_v28 = vpop.f32.mrb[2].mxu0  ;;  %v246_v31 = vpop.f32.mrb[2].mxu1 }
  0xf8   :  { %v136_v29 = vmax.f32 %v130_v23, 0.0  ;;  %v133_v30 = vadd.f32 %v260_v20, %v132_v28  ;;  %v315_v32 = vpop.f32.mrb[3].mxu0  ;;  %v250_v33 = vmax.f32 %v244_v26, 0.0  ;;  %v247_v34 = vadd.f32 %v269_v21, %v246_v31  ;;  %v335_v35 = vpop.f32.mrb[3].mxu1 }
  0xfa   :  { %v137_v36 = vmax.f32 %v133_v30, 0.0  ;;  %v252_v37 = vadd.f32 %v250_v33, %v136_v29  ;;  %v251_v38 = vmax.f32 %v247_v34, 0.0 }
  0xfc   :  { %254 = vst [vmem:[%s457_s5] sm:$0xff] %v252_v37  ;;  %v253_v39 = vadd.f32 %v251_v38, %v137_v36 }
  0xfe   :  { %255 = vst [vmem:[%s457_s5 + $0x8] sm:$0xff] %v253_v39 }

</bundles_post_ra>
